<compile_context>
chip_gen: v6e
topology: v6e:2x2x1
jax: 0.10.0
libtpu: 0.0.40
codegen_flags: <defaults>
</compile_context>

<pallas_src>
import functools
import math

import jax
import jax.numpy as jnp
from jax.experimental import pallas as pl
from jax.experimental.pallas import tpu as pltpu


def _round_up(x, m):
    return ((x + m - 1) // m) * m


def _vmem_limit_bytes(need_bytes):
    """Generation-aware scoped-VMEM request: need + headroom, capped below the
    physical per-core capacity (64 MiB on v7x, 128 MiB on v5e/v6e)."""
    try:
        cap = int(pltpu.get_tpu_info().vmem_capacity_bytes)
    except Exception:
        cap = 64 << 20
    limit = min(int(need_bytes) + (8 << 20), (cap * 3) // 4)
    return int(max(limit, 16 << 20))


# ----------------------------------------------------------------------------
# Gather + MLP + batch-reduction kernel ('mean' / 'sum' / 'max')
# ----------------------------------------------------------------------------
def _gather_mlp_reduce_kernel(ids_ref, emb_hbm, w1_ref, b1_ref, w2_ref, b2_ref,
                              out_ref, x_vmem, sem, *, mode, ts, s_pad, inv_b):
    """One (row-tile si, batch b) grid step.

    ids_ref : SMEM (B * s_pad,) int32   -- flat scalar-prefetch token ids
    emb_hbm : HBM  (V, Hp) f32          -- embedding table (memory_space=ANY)
    w1/w2   : VMEM (Hp, Hp) bf16        -- whole-array resident (single copy)
    b1/b2   : VMEM (1, Hp)  f32         -- whole-array resident (single copy)
    out_ref : VMEM (ts, Hp) f32         -- resident across the batch axis
    x_vmem  : VMEM (2, ts, Hp) f32      -- double-buffered gather scratch
    sem     : DMA semaphores (2,)       -- one per gather slot
    """
    si = pl.program_id(0)          # row-tile index ('parallel')
    b = pl.program_id(1)           # batch index    ('arbitrary' reduction axis)
    nb = pl.num_programs(1)
    slot = b % 2                   # gather slot resets with b at every row tile

    def issue_gather(batch, slot_):
        base = batch * s_pad + si * ts
        @pl.loop(0, ts)
        def _(r):
            idx = ids_ref[base + r]
            pltpu.make_async_copy(emb_hbm.at[pl.ds(idx, 1)],
                                  x_vmem.at[slot_, pl.ds(r, 1)],
                                  sem.at[slot_]).start()

    # First batch step of this row tile: fetch the current tile's rows.
    @pl.when(b == 0)
    def _fetch_first():
        issue_gather(0, 0)

    # ONE aggregate wait per slot: descriptor byte count (ts * Hp * 4, f32) must
    # equal the sum of the ts per-row copies signalled onto sem[slot].
    pltpu.make_async_copy(emb_hbm.at[pl.ds(0, ts)], x_vmem.at[slot],
                          sem.at[slot]).wait()

    # Prefetch the next batch's rows into the other slot; hidden behind the MXU.
    @pl.when(b + 1 < nb)
    def _prefetch_next():
        issue_gather(b + 1, 1 - slot)

    # ---- mlp_head: Linear -> ReLU -> Linear -> ReLU (bf16 MXU, f32 accum) ----
    x = x_vmem[slot].astype(jnp.bfloat16)                            # (ts, Hp)
    h1 = jnp.dot(x, w1_ref[...], preferred_element_type=jnp.float32) + b1_ref[...]
    h1 = jnp.maximum(h1, 0.0)
    h2 = jnp.dot(h1.astype(jnp.bfloat16), w2_ref[...],
                 preferred_element_type=jnp.float32) + b2_ref[...]
    h2 = jnp.maximum(h2, 0.0)                                        # (ts, Hp) f32

    # ---- reduction over batch axis, accumulated in the resident out block -----
    @pl.when(b == 0)
    def _init():
        out_ref[...] = h2

    @pl.when(b > 0)
    def _accumulate():
        if mode == "max":
            out_ref[...] = jnp.maximum(out_ref[...], h2)
        else:                                  # 'mean' / 'sum'
            out_ref[...] = out_ref[...] + h2

    if mode == "mean":
        @pl.when(b == nb - 1)
        def _finalize():
            out_ref[...] = out_ref[...] * inv_b


def fused_gather_mlp_reduce(ids, emb_padded, w1_p, b1_p, w2_p, b2_p, *,
                            mode, h_valid):
    """Fused gather + mlp_head + batch reduction.

    ids        : (B, S) int32 indices into emb_padded
    emb_padded : (V, Hp) float32   (Hp multiple of 128)
    w1_p, w2_p : (Hp, Hp) bfloat16 ; b1_p, b2_p : (1, Hp) float32
    returns    : (S, h_valid) float32 (reduced over B)
    """
    B, S = ids.shape
    V, Hp = emb_padded.shape

    ts = min(256, _round_up(max(S, 1), 8))         # row tile (MXU M dim)
    ts = max(8, min(ts, (V // 8) * 8))             # aggregate-wait needs ts <= V
    s_pad = _round_up(S, ts)
    # 1-D flat ids keep the SMEM scalar-prefetch footprint near raw size.
    ids_p = jnp.pad(ids.astype(jnp.int32), ((0, 0), (0, s_pad - S))).reshape(-1)

    kernel = functools.partial(_gather_mlp_reduce_kernel, mode=mode, ts=ts,
                               s_pad=s_pad, inv_b=1.0 / B)

    w_bytes = Hp * Hp * w1_p.dtype.itemsize
    need = (2 * w_bytes + 2 * Hp * 4          # resident weights/biases (1 copy)
            + 2 * ts * Hp * 4                 # double-buffered output block
            + 2 * ts * Hp * 4)                # double-buffered gather scratch
    flops = 2 * 2 * B * s_pad * Hp * Hp
    bytes_accessed = (B * s_pad * Hp * 4 + 2 * w_bytes + 2 * Hp * 4
                      + B * s_pad * 4 + s_pad * Hp * 4)

    grid_spec = pltpu.PrefetchScalarGridSpec(
        num_scalar_prefetch=1,
        grid=(s_pad // ts, B),
        in_specs=[
            pl.BlockSpec(memory_space=pl.ANY),                    # emb table (HBM)
            pl.BlockSpec(memory_space=pltpu.MemorySpace.VMEM),    # w1 (resident)
            pl.BlockSpec(memory_space=pltpu.MemorySpace.VMEM),    # b1
            pl.BlockSpec(memory_space=pltpu.MemorySpace.VMEM),    # w2 (resident)
            pl.BlockSpec(memory_space=pltpu.MemorySpace.VMEM),    # b2
        ],
        out_specs=pl.BlockSpec((ts, Hp), lambda si, b, ids: (si, 0)),
        scratch_shapes=[
            pltpu.VMEM((2, ts, Hp), jnp.float32),      # double-buffered gather
            pltpu.SemaphoreType.DMA((2,)),             # one sem per slot
        ],
    )

    out = pl.pallas_call(
        kernel,
        out_shape=jax.ShapeDtypeStruct((s_pad, Hp), jnp.float32),
        grid_spec=grid_spec,
        compiler_params=pltpu.CompilerParams(
            dimension_semantics=("parallel", "arbitrary"),
            vmem_limit_bytes=_vmem_limit_bytes(need)),
        cost_estimate=pl.CostEstimate(flops=flops, transcendentals=0,
                                      bytes_accessed=bytes_accessed),
    )(ids_p, emb_padded, w1_p, b1_p, w2_p, b2_p)

    return out[:S, :h_valid]


# ----------------------------------------------------------------------------
# Contiguous-rows MLP kernel ('none' branch: ids are 0..P-1, no gather needed)
# ----------------------------------------------------------------------------
def _mlp_rows_kernel(x_ref, w1_ref, b1_ref, w2_ref, b2_ref, out_ref):
    h1 = jnp.dot(x_ref[...], w1_ref[...],
                 preferred_element_type=jnp.float32) + b1_ref[...]
    h1 = jnp.maximum(h1, 0.0)
    h2 = jnp.dot(h1.astype(jnp.bfloat16), w2_ref[...],
                 preferred_element_type=jnp.float32) + b2_ref[...]
    out_ref[...] = jnp.maximum(h2, 0.0)


def mlp_rows(x_rows_bf16, w1_p, b1_p, w2_p, b2_p, *, h_valid):
    """mlp_head over contiguous rows; x auto-pipelined as full bf16 tiles."""
    P, Hp = x_rows_bf16.shape
    ts = min(256, _round_up(max(P, 1), 16))    # bf16 blocks: sublanes multiple of 16
    p_pad = _round_up(P, ts)
    x_p = jnp.pad(x_rows_bf16, ((0, p_pad - P), (0, 0)))

    w_bytes = Hp * Hp * 2
    need = 2 * w_bytes + 2 * Hp * 4 + 2 * ts * Hp * 2 + 2 * ts * Hp * 4
    flops = 2 * 2 * p_pad * Hp * Hp
    bytes_accessed = p_pad * Hp * 2 + 2 * w_bytes + 2 * Hp * 4 + p_pad * Hp * 4

    grid_spec = pltpu.PrefetchScalarGridSpec(
        num_scalar_prefetch=0,
        grid=(p_pad // ts,),
        in_specs=[
            pl.BlockSpec((ts, Hp), lambda i: (i, 0)),              # contiguous tile
            pl.BlockSpec(memory_space=pltpu.MemorySpace.VMEM),     # w1 (resident)
            pl.BlockSpec(memory_space=pltpu.MemorySpace.VMEM),     # b1
            pl.BlockSpec(memory_space=pltpu.MemorySpace.VMEM),     # w2 (resident)
            pl.BlockSpec(memory_space=pltpu.MemorySpace.VMEM),     # b2
        ],
        out_specs=pl.BlockSpec((ts, Hp), lambda i: (i, 0)),
    )

    out = pl.pallas_call(
        _mlp_rows_kernel,
        out_shape=jax.ShapeDtypeStruct((p_pad, Hp), jnp.float32),
        grid_spec=grid_spec,
        compiler_params=pltpu.CompilerParams(
            dimension_semantics=("parallel",),
            vmem_limit_bytes=_vmem_limit_bytes(need)),
        cost_estimate=pl.CostEstimate(flops=flops, transcendentals=0,
                                      bytes_accessed=bytes_accessed),
    )(x_p, w1_p, b1_p, w2_p, b2_p)

    return out[:P, :h_valid]


# ----------------------------------------------------------------------------
# Module wrapper
# ----------------------------------------------------------------------------
class PromptEncoderPallas:
    """JAX/Pallas re-implementation of PromptEncoder's forward pass.

    Supported prompt_operation: 'mean', 'sum', 'max', 'none'.
    """

    def __init__(self, key, *, vocab_size, hidden_size, pre_seq_len,
                 prompt_operation):
        self.hidden_size = hidden_size
        self.pre_seq_len = pre_seq_len
        self.prompt_operation = prompt_operation

        ks = jax.random.split(key, 6)
        H = hidden_size
        Hp = _round_up(H, 128)
        self._hp = Hp

        # Raw f32 parameters (mirror the PyTorch module; used by the reference).
        self.specific_embeddings = jax.random.normal(
            ks[0], (vocab_size, H), jnp.float32) * 0.02       # model input embeddings
        self.nomal_embeddings = jax.random.normal(
            ks[1], (pre_seq_len, H), jnp.float32) * 0.02      # nn.Embedding(pre_seq_len, H)
        bound = 1.0 / math.sqrt(H)                            # PyTorch Linear default init
        self.mlp_w1 = jax.random.uniform(ks[2], (H, H), jnp.float32, -bound, bound)
        self.mlp_b1 = jax.random.uniform(ks[3], (H,), jnp.float32, -bound, bound)
        self.mlp_w2 = jax.random.uniform(ks[4], (H, H), jnp.float32, -bound, bound)
        self.mlp_b2 = jax.random.uniform(ks[5], (H,), jnp.float32, -bound, bound)

        # Kernel-side parameters: padded lane-dense (Hp multiple of 128).
        padH = Hp - H
        # Gather table stays f32 (single-row DMAs; see TODO at the top of file).
        self._emb_spec_p = jnp.pad(self.specific_embeddings, ((0, 0), (0, padH)))
        # 'none' path table is bf16 and fetched as contiguous, tile-aligned blocks.
        self._emb_norm_bf16 = jnp.pad(
            self.nomal_embeddings, ((0, 0), (0, padH))).astype(jnp.bfloat16)
        self._w1_p = jnp.pad(self.mlp_w1, ((0, padH), (0, padH))).astype(jnp.bfloat16)
        self._w2_p = jnp.pad(self.mlp_w2, ((0, padH), (0, padH))).astype(jnp.bfloat16)
        self._b1_p = jnp.pad(self.mlp_b1.reshape(1, H), ((0, 0), (0, padH)))
        self._b2_p = jnp.pad(self.mlp_b2.reshape(1, H), ((0, 0), (0, padH)))

    def forward(self, sentences_encoded=None):
        op = self.prompt_operation
        H = self.hidden_size

        if op in ("mean", "sum", "max"):
            B, S = sentences_encoded.shape
            out = fused_gather_mlp_reduce(
                sentences_encoded, self._emb_spec_p,
                self._w1_p, self._b1_p, self._w2_p, self._b2_p,
                mode=op, h_valid=H)                           # (S, H): reduced over B
            if B == 1:
                # torch .squeeze() drops the size-1 batch dim, so the reduction
                # then acts over the sequence dim instead.
                # TODO(synk): S==1 squeeze edge case not emulated.
                if op == "mean":
                    out = jnp.mean(out, axis=0)
                elif op == "sum":
                    out = jnp.sum(out, axis=0)
                else:
                    out = jnp.max(out, axis=0)
            return out

        elif op == "none":
            # nomal_embeddings(seq_indices).unsqueeze(0) -> mlp_head -> squeeze
            out = mlp_rows(self._emb_norm_bf16, self._w1_p, self._b1_p,
                           self._w2_p, self._b2_p, h_valid=H)  # (P, H)
            if self.pre_seq_len == 1:
                out = out[0]                                    # torch .squeeze()
            return out

        else:
            raise NotImplementedError(
                f"The prompt_operation for {op} has not been defined (in Pallas port).")


def _reference(enc, sentences_encoded, op):
    """Pure-JAX f32 reference mirroring the PyTorch forward."""
    if op == "none":
        x = enc.nomal_embeddings[None]                                    # (1, P, H)
    else:
        x = jnp.take(enc.specific_embeddings, sentences_encoded, axis=0)  # (B, S, H)
    h = jnp.maximum(jnp.einsum("bsh,hk->bsk", x, enc.mlp_w1) + enc.mlp_b1, 0.0)
    h = jnp.maximum(jnp.einsum("bsh,hk->bsk", h, enc.mlp_w2) + enc.mlp_b2, 0.0)
    h = jnp.squeeze(h)                                                    # torch .squeeze()
    if op == "mean":
        return jnp.mean(h, axis=0)
    if op == "sum":
        return jnp.sum(h, axis=0)
    if op == "max":
        return jnp.max(h, axis=0)
    return h


if __name__ == "__main__":
    key = jax.random.PRNGKey(0)
    B, S, H = 2, 8, 32
    VOCAB = 100
    PRE_SEQ_LEN = 4

    k_param, k_ids = jax.random.split(key)
    sentences_encoded = jax.random.randint(k_ids, (B, S), 0, VOCAB, dtype=jnp.int32)

    failures = []
    for op in ("mean", "sum", "max", "none"):
        enc = PromptEncoderPallas(
            k_param, vocab_size=VOCAB, hidden_size=H,
            pre_seq_len=PRE_SEQ_LEN, prompt_operation=op)
        out = jax.block_until_ready(enc.forward(sentences_encoded))
        ref = _reference(enc, sentences_encoded, op)
        # bf16 weights/embeddings on the MXU vs f32 reference -> loosened tolerance.
        if out.shape != ref.shape or not jnp.allclose(out, ref, atol=2e-2, rtol=2e-2):
            failures.append((op, out.shape, ref.shape,
                             float(jnp.max(jnp.abs(out - ref))) if out.shape == ref.shape else None))

    if failures:
        raise AssertionError(f"mismatches: {failures}")
    print("KERNEL_OK")
</pallas_src>

<mosaic_0001>
module attributes {stable_mosaic.version = 11 : i64} {
  func.func @_gather_mlp_reduce_kernel(%arg0: i32, %arg1: i32, %arg2: memref<16xi32, #tpu.memory_space<smem>>, %arg3: memref<100x128xf32, #tpu.memory_space<any>>, %arg4: memref<128x128xbf16, #tpu.memory_space<vmem>>, %arg5: memref<1x128xf32, #tpu.memory_space<vmem>>, %arg6: memref<128x128xbf16, #tpu.memory_space<vmem>>, %arg7: memref<1x128xf32, #tpu.memory_space<vmem>>, %arg8: memref<8x128xf32, #tpu.memory_space<vmem>>, %arg9: memref<2x8x128xf32, #tpu.memory_space<vmem>>, %arg10: memref<2x!tpu.dma_semaphore, #tpu.memory_space<semaphore_mem>>) attributes {dimension_semantics = [#tpu.dimension_semantics<parallel>, #tpu.dimension_semantics<arbitrary>], iteration_bounds = array<i64: 1, 2>, scalar_prefetch = 1 : i64, scratch_operands = 2 : i64, tpu.core_type = #tpu.core_type<tc>, window_params = [{}, {pipeline_mode = #tpu.pipeline_mode<synchronous>, transform_indices = @transform_1, window_bounds = array<i64: 128, 128>}, {pipeline_mode = #tpu.pipeline_mode<synchronous>, transform_indices = @transform_2, window_bounds = array<i64: 1, 128>}, {pipeline_mode = #tpu.pipeline_mode<synchronous>, transform_indices = @transform_3, window_bounds = array<i64: 128, 128>}, {pipeline_mode = #tpu.pipeline_mode<synchronous>, transform_indices = @transform_4, window_bounds = array<i64: 1, 128>}, {transform_indices = @transform_5, window_bounds = array<i64: 8, 128>}]} {
    %c2_i32 = arith.constant 2 : i32
    %c0_i32 = arith.constant 0 : i32
    %0 = arith.cmpi eq, %c2_i32, %c0_i32 : i32
    %c1_i32 = arith.constant 1 : i32
    %1 = arith.select %0, %c1_i32, %c2_i32 : i32
    %2 = arith.remsi %arg1, %1 : i32
    %c0_i32_0 = arith.constant 0 : i32
    %3 = arith.cmpi ne, %2, %c0_i32_0 : i32
    %c0_i32_1 = arith.constant 0 : i32
    %4 = arith.cmpi slt, %2, %c0_i32_1 : i32
    %c0_i32_2 = arith.constant 0 : i32
    %5 = arith.cmpi slt, %1, %c0_i32_2 : i32
    %6 = arith.xori %4, %5 : i1
    %7 = arith.andi %6, %3 : i1
    %8 = arith.addi %2, %1 : i32
    %9 = arith.select %7, %8, %2 : i32
    %c0_i32_3 = arith.constant 0 : i32
    %10 = arith.cmpi eq, %arg1, %c0_i32_3 : i32
    %11 = arith.extui %10 : i1 to i32
    %c0_i32_4 = arith.constant 0 : i32
    %12 = arith.cmpi ne, %11, %c0_i32_4 : i32
    scf.if %12 {
      %c8_i32 = arith.constant 8 : i32
      %50 = arith.muli %arg0, %c8_i32 : i32
      %c0_i32_30 = arith.constant 0 : i32
      %51 = arith.addi %c0_i32_30, %50 : i32
      %c0_i32_31 = arith.constant 0 : i32
      %c8_i32_32 = arith.constant 8 : i32
      %52 = arith.addi %c0_i32_31, %c8_i32_32 : i32
      %c1_i32_33 = arith.constant 1 : i32
      scf.for %arg11 = %c0_i32_31 to %52 step %c1_i32_33  : i32 {
        %c1_i32_35 = arith.constant 1 : i32
        %53 = arith.muli %arg11, %c1_i32_35 : i32
        %c0_i32_36 = arith.constant 0 : i32
        %54 = arith.addi %c0_i32_36, %53 : i32
        %55 = arith.addi %51, %54 : i32
        %56 = arith.index_cast %55 : i32 to index
        %57 = memref.load %arg2[%56] : memref<16xi32, #tpu.memory_space<smem>>
        %c0_i32_37 = arith.constant 0 : i32
        %c0_i32_38 = arith.constant 0 : i32
        %c0_i32_39 = arith.constant 0 : i32
        %58 = tpu.memref_slice %arg3[%57, %c0_i32_39] : memref<100x128xf32, #tpu.memory_space<any>> -> memref<1x128xf32, #tpu.memory_space<any>>
        %c0_i32_40 = arith.constant 0 : i32
        %59 = tpu.memref_slice %arg9[%c0_i32_37, %54, %c0_i32_40] : memref<2x8x128xf32, #tpu.memory_space<vmem>> -> memref<1x1x128xf32, #tpu.memory_space<vmem>>
        %60 = tpu.memref_squeeze %59 : memref<1x1x128xf32, #tpu.memory_space<vmem>> -> memref<1x128xf32, #tpu.memory_space<vmem>>
        %61 = tpu.memref_slice %arg10[%c0_i32_38] : memref<2x!tpu.dma_semaphore, #tpu.memory_space<semaphore_mem>> -> memref<1x!tpu.dma_semaphore, #tpu.memory_space<semaphore_mem>>
        %62 = tpu.memref_squeeze %61 : memref<1x!tpu.dma_semaphore, #tpu.memory_space<semaphore_mem>> -> memref<!tpu.dma_semaphore, #tpu.memory_space<semaphore_mem>>
        tpu.enqueue_dma source(%58 : memref<1x128xf32, #tpu.memory_space<any>>) target(%60 : memref<1x128xf32, #tpu.memory_space<vmem>>) target_semaphore(%62 : memref<!tpu.dma_semaphore, #tpu.memory_space<semaphore_mem>>)
      }
      %c8_i32_34 = arith.constant 8 : i32
    } else {
    }
    %c0_i32_5 = arith.constant 0 : i32
    %c0_i32_6 = arith.constant 0 : i32
    %13 = tpu.memref_slice %arg3[%c0_i32_5, %c0_i32_6] : memref<100x128xf32, #tpu.memory_space<any>> -> memref<8x128xf32, #tpu.memory_space<any>>
    %c0_i32_7 = arith.constant 0 : i32
    %c0_i32_8 = arith.constant 0 : i32
    %14 = tpu.memref_slice %arg9[%9, %c0_i32_7, %c0_i32_8] : memref<2x8x128xf32, #tpu.memory_space<vmem>> -> memref<1x8x128xf32, #tpu.memory_space<vmem>>
    %15 = tpu.memref_squeeze %14 : memref<1x8x128xf32, #tpu.memory_space<vmem>> -> memref<8x128xf32, #tpu.memory_space<vmem>>
    %16 = tpu.memref_slice %arg10[%9] : memref<2x!tpu.dma_semaphore, #tpu.memory_space<semaphore_mem>> -> memref<1x!tpu.dma_semaphore, #tpu.memory_space<semaphore_mem>>
    %17 = tpu.memref_squeeze %16 : memref<1x!tpu.dma_semaphore, #tpu.memory_space<semaphore_mem>> -> memref<!tpu.dma_semaphore, #tpu.memory_space<semaphore_mem>>
    tpu.wait_dma2 semaphore(%17 : memref<!tpu.dma_semaphore, #tpu.memory_space<semaphore_mem>>) src(%13 : memref<8x128xf32, #tpu.memory_space<any>>) dst(%15 : memref<8x128xf32, #tpu.memory_space<vmem>>)
    %c1_i32_9 = arith.constant 1 : i32
    %18 = arith.addi %arg1, %c1_i32_9 : i32
    %c2_i32_10 = arith.constant 2 : i32
    %19 = arith.cmpi slt, %18, %c2_i32_10 : i32
    %20 = arith.extui %19 : i1 to i32
    %c0_i32_11 = arith.constant 0 : i32
    %21 = arith.cmpi ne, %20, %c0_i32_11 : i32
    scf.if %21 {
      %c1_i32_30 = arith.constant 1 : i32
      %50 = arith.addi %arg1, %c1_i32_30 : i32
      %c1_i32_31 = arith.constant 1 : i32
      %51 = arith.subi %c1_i32_31, %9 : i32
      %c8_i32 = arith.constant 8 : i32
      %52 = arith.muli %50, %c8_i32 : i32
      %c8_i32_32 = arith.constant 8 : i32
      %53 = arith.muli %arg0, %c8_i32_32 : i32
      %54 = arith.addi %52, %53 : i32
      %c0_i32_33 = arith.constant 0 : i32
      %c8_i32_34 = arith.constant 8 : i32
      %55 = arith.addi %c0_i32_33, %c8_i32_34 : i32
      %c1_i32_35 = arith.constant 1 : i32
      scf.for %arg11 = %c0_i32_33 to %55 step %c1_i32_35  : i32 {
        %c1_i32_37 = arith.constant 1 : i32
        %56 = arith.muli %arg11, %c1_i32_37 : i32
        %c0_i32_38 = arith.constant 0 : i32
        %57 = arith.addi %c0_i32_38, %56 : i32
        %58 = arith.addi %54, %57 : i32
        %59 = arith.index_cast %58 : i32 to index
        %60 = memref.load %arg2[%59] : memref<16xi32, #tpu.memory_space<smem>>
        %c0_i32_39 = arith.constant 0 : i32
        %61 = tpu.memref_slice %arg3[%60, %c0_i32_39] : memref<100x128xf32, #tpu.memory_space<any>> -> memref<1x128xf32, #tpu.memory_space<any>>
        %c0_i32_40 = arith.constant 0 : i32
        %62 = tpu.memref_slice %arg9[%51, %57, %c0_i32_40] : memref<2x8x128xf32, #tpu.memory_space<vmem>> -> memref<1x1x128xf32, #tpu.memory_space<vmem>>
        %63 = tpu.memref_squeeze %62 : memref<1x1x128xf32, #tpu.memory_space<vmem>> -> memref<1x128xf32, #tpu.memory_space<vmem>>
        %64 = tpu.memref_slice %arg10[%51] : memref<2x!tpu.dma_semaphore, #tpu.memory_space<semaphore_mem>> -> memref<1x!tpu.dma_semaphore, #tpu.memory_space<semaphore_mem>>
        %65 = tpu.memref_squeeze %64 : memref<1x!tpu.dma_semaphore, #tpu.memory_space<semaphore_mem>> -> memref<!tpu.dma_semaphore, #tpu.memory_space<semaphore_mem>>
        tpu.enqueue_dma source(%61 : memref<1x128xf32, #tpu.memory_space<any>>) target(%63 : memref<1x128xf32, #tpu.memory_space<vmem>>) target_semaphore(%65 : memref<!tpu.dma_semaphore, #tpu.memory_space<semaphore_mem>>)
      }
      %c8_i32_36 = arith.constant 8 : i32
    } else {
    }
    %22 = arith.index_cast %9 : i32 to index
    %c0 = arith.constant 0 : index
    %c0_12 = arith.constant 0 : index
    %23 = vector.load %arg9[%22, %c0, %c0_12] : memref<2x8x128xf32, #tpu.memory_space<vmem>>, vector<1x8x128xf32>
    %24 = vector.shape_cast %23 : vector<1x8x128xf32> to vector<8x128xf32>
    %25 = arith.truncf %24 : vector<8x128xf32> to vector<8x128xbf16>
    %c0_13 = arith.constant 0 : index
    %c0_14 = arith.constant 0 : index
    %26 = vector.load %arg4[%c0_13, %c0_14] : memref<128x128xbf16, #tpu.memory_space<vmem>>, vector<128x128xbf16>
    %cst = arith.constant dense<0.000000e+00> : vector<8x128xf32>
    %27 = tpu.matmul %25, %26, %cst {dimension_numbers = #tpu.dot_dimension_numbers<[1], [0], [0], [1], [0, 0, 1, 1], [], []>} : vector<8x128xbf16>, vector<128x128xbf16>, vector<8x128xf32> -> vector<8x128xf32>
    %c0_15 = arith.constant 0 : index
    %c0_16 = arith.constant 0 : index
    %28 = vector.load %arg5[%c0_15, %c0_16] : memref<1x128xf32, #tpu.memory_space<vmem>>, vector<1x128xf32>
    %29 = vector.broadcast %28 : vector<1x128xf32> to vector<8x128xf32>
    %30 = arith.addf %27, %29 : vector<8x128xf32>
    %cst_17 = arith.constant 0.000000e+00 : f32
    %31 = vector.broadcast %cst_17 : f32 to vector<8x128xf32>
    %32 = arith.maximumf %30, %31 : vector<8x128xf32>
    %33 = arith.truncf %32 : vector<8x128xf32> to vector<8x128xbf16>
    %c0_18 = arith.constant 0 : index
    %c0_19 = arith.constant 0 : index
    %34 = vector.load %arg6[%c0_18, %c0_19] : memref<128x128xbf16, #tpu.memory_space<vmem>>, vector<128x128xbf16>
    %cst_20 = arith.constant dense<0.000000e+00> : vector<8x128xf32>
    %35 = tpu.matmul %33, %34, %cst_20 {dimension_numbers = #tpu.dot_dimension_numbers<[1], [0], [0], [1], [0, 0, 1, 1], [], []>} : vector<8x128xbf16>, vector<128x128xbf16>, vector<8x128xf32> -> vector<8x128xf32>
    %c0_21 = arith.constant 0 : index
    %c0_22 = arith.constant 0 : index
    %36 = vector.load %arg7[%c0_21, %c0_22] : memref<1x128xf32, #tpu.memory_space<vmem>>, vector<1x128xf32>
    %37 = vector.broadcast %36 : vector<1x128xf32> to vector<8x128xf32>
    %38 = arith.addf %35, %37 : vector<8x128xf32>
    %cst_23 = arith.constant 0.000000e+00 : f32
    %39 = vector.broadcast %cst_23 : f32 to vector<8x128xf32>
    %40 = arith.maximumf %38, %39 : vector<8x128xf32>
    %c0_i32_24 = arith.constant 0 : i32
    %41 = arith.cmpi eq, %arg1, %c0_i32_24 : i32
    %42 = arith.extui %41 : i1 to i32
    %c0_i32_25 = arith.constant 0 : i32
    %43 = arith.cmpi ne, %42, %c0_i32_25 : i32
    scf.if %43 {
      %c0_30 = arith.constant 0 : index
      %c0_31 = arith.constant 0 : index
      %50 = vector.load %arg8[%c0_30, %c0_31] : memref<8x128xf32, #tpu.memory_space<vmem>>, vector<8x128xf32>
      tpu.vector_store %arg8[%c0_30, %c0_31], %40 {strides = array<i32>} : memref<8x128xf32, #tpu.memory_space<vmem>>, vector<8x128xf32>,
    } else {
    }
    %c0_i32_26 = arith.constant 0 : i32
    %44 = arith.cmpi sgt, %arg1, %c0_i32_26 : i32
    %45 = arith.extui %44 : i1 to i32
    %c0_i32_27 = arith.constant 0 : i32
    %46 = arith.cmpi ne, %45, %c0_i32_27 : i32
    scf.if %46 {
      %c0_30 = arith.constant 0 : index
      %c0_31 = arith.constant 0 : index
      %50 = vector.load %arg8[%c0_30, %c0_31] : memref<8x128xf32, #tpu.memory_space<vmem>>, vector<8x128xf32>
      %51 = arith.addf %50, %40 : vector<8x128xf32>
      %c0_32 = arith.constant 0 : index
      %c0_33 = arith.constant 0 : index
      %52 = vector.load %arg8[%c0_32, %c0_33] : memref<8x128xf32, #tpu.memory_space<vmem>>, vector<8x128xf32>
      tpu.vector_store %arg8[%c0_32, %c0_33], %51 {strides = array<i32>} : memref<8x128xf32, #tpu.memory_space<vmem>>, vector<8x128xf32>,
    } else {
    }
    %c1_i32_28 = arith.constant 1 : i32
    %47 = arith.cmpi eq, %arg1, %c1_i32_28 : i32
    %48 = arith.extui %47 : i1 to i32
    %c0_i32_29 = arith.constant 0 : i32
    %49 = arith.cmpi ne, %48, %c0_i32_29 : i32
    scf.if %49 {
      %c0_30 = arith.constant 0 : index
      %c0_31 = arith.constant 0 : index
      %50 = vector.load %arg8[%c0_30, %c0_31] : memref<8x128xf32, #tpu.memory_space<vmem>>, vector<8x128xf32>
      %cst_32 = arith.constant 5.000000e-01 : f32
      %51 = vector.broadcast %cst_32 : f32 to vector<8x128xf32>
      %52 = arith.mulf %50, %51 : vector<8x128xf32>
      %c0_33 = arith.constant 0 : index
      %c0_34 = arith.constant 0 : index
      %53 = vector.load %arg8[%c0_33, %c0_34] : memref<8x128xf32, #tpu.memory_space<vmem>>, vector<8x128xf32>
      tpu.vector_store %arg8[%c0_33, %c0_34], %52 {strides = array<i32>} : memref<8x128xf32, #tpu.memory_space<vmem>>, vector<8x128xf32>,
    } else {
    }
    return
  }
  func.func @transform_1(%arg0: i32, %arg1: i32, %arg2: memref<16xi32, #tpu.memory_space<smem>>) -> (i32, i32) {
    %c0_i32 = arith.constant 0 : i32
    %c0_i32_0 = arith.constant 0 : i32
    %c0_i32_1 = arith.constant 0 : i32
    return %c0_i32, %c0_i32_0 : i32, i32
  }
  func.func @transform_2(%arg0: i32, %arg1: i32, %arg2: memref<16xi32, #tpu.memory_space<smem>>) -> (i32, i32) {
    %c0_i32 = arith.constant 0 : i32
    %c0_i32_0 = arith.constant 0 : i32
    %c0_i32_1 = arith.constant 0 : i32
    return %c0_i32, %c0_i32_0 : i32, i32
  }
  func.func @transform_3(%arg0: i32, %arg1: i32, %arg2: memref<16xi32, #tpu.memory_space<smem>>) -> (i32, i32) {
    %c0_i32 = arith.constant 0 : i32
    %c0_i32_0 = arith.constant 0 : i32
    %c0_i32_1 = arith.constant 0 : i32
    return %c0_i32, %c0_i32_0 : i32, i32
  }
  func.func @transform_4(%arg0: i32, %arg1: i32, %arg2: memref<16xi32, #tpu.memory_space<smem>>) -> (i32, i32) {
    %c0_i32 = arith.constant 0 : i32
    %c0_i32_0 = arith.constant 0 : i32
    %c0_i32_1 = arith.constant 0 : i32
    return %c0_i32, %c0_i32_0 : i32, i32
  }
  func.func @transform_5(%arg0: i32, %arg1: i32, %arg2: memref<16xi32, #tpu.memory_space<smem>>) -> (i32, i32) {
    %c0_i32 = arith.constant 0 : i32
    %c0_i32_0 = arith.constant 0 : i32
    return %arg0, %c0_i32 : i32, i32
  }
}

</mosaic_0001>

<bundles_post_ra>
// kernel: tpu_custom_call.1
= control target key start
LH: loop header
LB: loop body
LE: loop exit
PB: predicated region body
PF: predicated region fallthrough
CT: control target
= control target key end

     0   :  { %s1023_s21 = smov [#allocation5]   ;;  %s1235_s0 = inlined_call_operand.hbm [shape: s32[16], index: 0, kind: input, shape index: {}]   ;;  %s1236_s1 = inlined_call_operand.hbm [shape: f32[100,128], index: 1, kind: input, shape index: {}]   ;;  %s1237_s2 = inlined_call_operand.hbm [shape: bf16[128,128], index: 2, kind: input, shape index: {}]   ;;  %s1238_s3 = inlined_call_operand.vmem [shape: f32[1,128], index: 3, kind: input, shape index: {}]   ;;  %s1239_s4 = inlined_call_operand.hbm [shape: bf16[128,128], index: 4, kind: input, shape index: {}]   ;;  %s1240_s5 = inlined_call_operand.vmem [shape: f32[1,128], index: 5, kind: input, shape index: {}]   ;;  %s1241_s6 = inlined_call_operand.hbm [shape: f32[8,128], index: 6, kind: output, shape index: {}]  }
   0x1   :  { %1243 = sst [smem:[#allocation23_spill]] %s1237_s2 }
   0x2   :  { %12 = dma.hbm_to_smem %s1235_s0, 16, %s1023_s21, [#allocation4] }
   0x3   :  { %987 = dma.done.wait [#allocation4], 16 }
   0x4   :  { %988 = vsyncadd [#allocation4], 4294967280 }
   0x5   :  { %14 = sfence }
   0x6   :  { %15 = vsyncpa [#allocation7], 0 }
   0x7   :  { %16 = vsyncpa [#allocation10], 0 }
   0x8   :  { %17 = vsyncpa [#allocation8], 0  ;;  %s1071_s24 = smov 0   ;;  %s1073_s25 = smov 0  }
   0x9   :  { %s1075_s26 = smov 0  }
   0xa LB: > { %s1242_s0 = sadd.s32 4294967295, %s1013_s26   ;;  %s32_s27 = sadd.s32 1, %s1009_s25  ;;  %s1013_s26 = sphi %s1075_s26, %s23_s26   ;;  %s1009_s25 = sphi %s1073_s25, %s1251_s25   ;;  %s1005_s24 = sphi %s1071_s24, %s1250_s24  }
   0xb   : > { %p33_p0 = scmp.ge.s32.totalorder %s32_s27, 2  ;;  %p647_p1 = scmp.ge.s32.totalorder %s1013_s26, 1 }
   0xc   : > { %p150_p2 = scmp.lt.s32.totalorder %s1013_s26, 3  ;;  %p1098_p4 = scmp.eq.s32.totalorder %s1242_s0, 0 }
   0xd   : > { %s1253_s27 = smov (%p33_p0, %s32_s27), 0  ;;  %s1024_s30 = smov [#allocation6]  }
   0xe   : > { %p1092_p3 = pnand %p647_p1, %p150_p2  ;;  %s162_s7 = sshll.u32 %s1024_s30, 4  ;;  %s163_s7 = int_to_ptr.vmem [resolvable:$true] %s162_s7 }
   0xf   : > { %s1025_s9 = smov [#allocation9]   ;;  %s858_s11 = scalar_lea.vmem %s163_s7, 1024 }
  0x10   : > { %p762_p5 = pneg %p1092_p3  ;;  %s178_s10 = sshll.u32 %s1025_s9, 4  ;;  %s179_s10 = int_to_ptr.vmem [resolvable:$true] %s178_s10 }
  0x11   : > { %p859_p8 = scmp.ne.s32.totalorder %s163_s7, %s858_s11  ;;  %p866_p11 = scmp.lt.s32.totalorder %s163_s7, %s163_s7 }
  0x12   : > { %p1106_p6 = pnand %p1098_p4, %p762_p5  ;;  %p867_p12 = scmp.lt.s32.totalorder %s858_s11, %s858_s11 }
  0x14   : > { %p849_p7 = pneg %p1106_p6  ;;  %p868_p13 = por %p867_p12, %p866_p11 }
  0x16   : > { %p861_p9 = pnand %p859_p8, %p849_p7 }
  0x18   : > { %p862_p10 = pneg %p861_p9 }
  0x1a   : > { %p869_p0 = pnand %p868_p13, %p862_p10 }
  0x1c   : > { %872 = shalt.err (!%p869_p0)
}
  0x1d   : > { %s1026_s12 = smov 64   ;;  %s1027_s13 = smov 4  }
  0x1e   : > { %s1247_s2 = sld [smem:[#allocation23_spill]]  ;;  %s884_s16 = scalar_lea.vmem %s179_s10, 1024 }
  0x1f   : > { %p885_p1 = scmp.ne.s32.totalorder %s179_s10, %s884_s16  ;;  %p892_p8 = scmp.lt.s32.totalorder %s179_s10, %s179_s10 }
  0x20   : > { %p893_p9 = scmp.lt.s32.totalorder %s884_s16, %s884_s16 }
  0x21   : > { %p887_p2 = pnand %p885_p1, %p849_p7 }
  0x22   : > { %p894_p11 = por %p893_p9, %p892_p8 }
  0x23   : > { %p888_p5 = pneg %p887_p2 }
  0x24   : > { %765 = dma.hbm_to_vmem [thread:$0]  (!%p1106_p6), %s1247_s2, 1024, %s163_s7, [#allocation7], %s1026_s12, %s1026_s12, %s1027_s13  }
  0x25   : > { %p895_p10 = pnand %p894_p11, %p888_p5 }
  0x27   : > { %898 = shalt.err (!%p895_p10)
}
  0x28   : > { %768 = dma.hbm_to_vmem [thread:$0]  (!%p1106_p6), %s1239_s4, 1024, %s179_s10, [#allocation10], %s1026_s12, %s1026_s12, %s1027_s13  }
  0x29   : > { %197 = sbr.rel (%p1092_p3) target bundleno = 608 (0x260), region = 36 }
  0x2e   : > { %990 = dma.done.wait (%p1098_p4), [#allocation7], 1024  }
  0x2f   : > { %992 = vsyncadd (%p1098_p4), [#allocation7], 4294966272 }
  0x30   : > { %994 = dma.done.wait (%p1098_p4), [#allocation10], 1024  }
  0x31   : > { %996 = vsyncadd (%p1098_p4), [#allocation10], 4294966272  ;;  %p218_p7 = scmp.lt.s32.totalorder %s1005_s24, 0  ;;  %s219_s19 = ssub.s32 0, %s1005_s24 }
  0x32   : > { %s653_s20 = smin.u32 %s1005_s24, %s219_s19  ;;  %p656_p6 = scmp.ne.s32.totalorder %s1005_s24, 0 }
  0x33   : > { %s221_s21 = sand.u32 1, %s653_s20   ;;  %s1146_s28 = smov (!%p656_p6), 0  }
  0x34   : > { %s222_s22 = ssub.s32 0, %s221_s21  ;;  %233 = sbr.rel (%p656_p6) target bundleno = 92 (0x5c), region = 48 }
  0x35   : > { %s1255_s22 = smov (!%p218_p7, %s222_s22), %s221_s21 }
  0x36   : > { %p655_p3 = scmp.lt.s32.totalorder %s1255_s22, 0  ;;  %s228_s23 = sadd.s32 2, %s1255_s22 }
  0x38   : > { %s1257_s23 = smov (!%p655_p3, %s228_s23), %s1255_s22 }
  0x39 LB: >> { %s242_s29 = sld [smem:[#allocation5 + %s1017_s28]]  ;;  %s245_s30 = scalar_lea.vmem [#allocation2], %s1017_s28  ;;  %s1017_s28 = sphi %s1146_s28, %s240_s28  }
  0x3a   : >> { %s253_s7 = sshll.u32 %s245_s30, 4  ;;  %s901_s15 = scalar_lea.hbm %s1236_s1, 1664  ;;  %s254_s7 = int_to_ptr.vmem [resolvable:$true] %s253_s7 }
  0x3f   : >> { %s657_s8 = sshll.u32 %s242_s29, 4 }
  0x40   : >> { %s244_s11 = scalar_lea.hbm %s1236_s1, %s657_s8 }
  0x41   : >> { %s899_s12 = scalar_lea.hbm %s244_s11, 16  ;;  %p902_p12 = scmp.lt.s32.totalorder %s244_s11, %s1236_s1 }
  0x42   : >> { %p900_p4 = scmp.ne.s32.totalorder %s244_s11, %s899_s12  ;;  %p903_p13 = scmp.lt.s32.totalorder %s901_s15, %s899_s12 }
  0x44   : >> { %p904_p0 = por %p903_p13, %p902_p12 }
  0x46   : >> { %p905_p1 = pnand %p904_p0, %p900_p4 }
  0x48   : >> { %908 = shalt.err (!%p905_p1)  }
  0x49   : >> { %s909_s18 = scalar_lea.vmem %s254_s7, 16  ;;  %s1028_s19 = smov [#allocation2]  }
  0x4a   : >> { %p910_p2 = scmp.ne.s32.totalorder %s254_s7, %s909_s18  ;;  %s911_s20 = sshll.u32 %s1028_s19, 4  ;;  %s912_s20 = int_to_ptr.vmem [resolvable:$false] %s911_s20 }
  0x4b   : >> { %s913_s21 = scalar_lea.vmem %s912_s20, 256  ;;  %p914_p5 = scmp.lt.s32.totalorder %s254_s7, %s912_s20 }
  0x4c   : >> { %p915_p8 = scmp.lt.s32.totalorder %s913_s21, %s909_s18 }
  0x4e   : >> { %p916_p9 = por %p915_p8, %p914_p5 }
  0x50   : >> { %p917_p11 = pnand %p916_p9, %p910_p2 }
  0x52   : >> { %920 = shalt.err (!%p917_p11)  }
  0x53   : >> { %256 = dma.hbm_to_vmem [thread:$0]  %s244_s11, 16, %s254_s7, [#allocation3] }
  0x54   : >> { %s240_s28 = sadd.s32 1, %s1017_s28  }
  0x55   : >> { %p237_p10 = scmp.ge.s32.totalorder %s240_s28, 8  }
  0x57   : > { %239 = sbr.rel (!%p237_p10) target bundleno = 57 (0x39), region = 120 }
  0x5c PF: > { %s658_s22 = sshll.u32 %s1257_s23, 3  ;;  %s259_s30 = scalar_lea.sflag [#allocation3], %s1257_s23 }
  0x5d   : > { %s1166_s29 = scalar_lea.vmem [#allocation2], %s658_s22 }
  0x5e   : > { %997 = dma.done.wait %s259_s30, 128 }
  0x5f   : > { %998 = vsyncadd %s259_s30, 4294967168  ;;  %s263_s8 = sadd.s32 1, %s1005_s24 }
  0x60   : > { %p659_p7 = scmp.ge.s32.totalorder %s263_s8, 2 }
  0x61   : > { %s268_s7 = ssub.s32 (!%p659_p7), 1, %s1257_s23  ;;  %s690_s9 = sshll.u32 (!%p659_p7), %s1005_s24, 3 }
  0x62   : > { %267 = sbr.rel (%p659_p7) target bundleno = 139 (0x8b), region = 63  ;;  %s1172_s10 = sadd.s32 (!%p659_p7), 8, %s690_s9 }
  0x63   : > { %s1174_s28 = smov (!%p659_p7), 0  }
  0x67 LB: >> { %s662_s11 = sshll.u32 %s268_s7, 3  ;;  %s278_s12 = sadd.s32 %s1021_s28, %s1172_s10  ;;  %s1021_s28 = sphi %s1174_s28, %s277_s28  }
  0x68   : >> { %s283_s13 = sadd.s32 %s1021_s28, %s662_s11  ;;  %s279_s14 = sld [smem:[#allocation5 + %s278_s12]] }
  0x69   : >> { %s284_s15 = scalar_lea.vmem [#allocation2], %s283_s13  ;;  %s285_s21 = scalar_lea.sflag [#allocation3], %s268_s7 }
  0x6a   : >> { %s293_s16 = sshll.u32 %s284_s15, 4  ;;  %s923_s9 = scalar_lea.hbm %s1236_s1, 1664  ;;  %s294_s16 = int_to_ptr.vmem [resolvable:$true] %s293_s16 }
  0x6e   : >> { %s661_s17 = sshll.u32 %s279_s14, 4 }
  0x6f   : >> { %s281_s20 = scalar_lea.hbm %s1236_s1, %s661_s17 }
  0x70   : >> { %s921_s22 = scalar_lea.hbm %s281_s20, 16  ;;  %p924_p4 = scmp.lt.s32.totalorder %s281_s20, %s1236_s1 }
  0x71   : >> { %p922_p3 = scmp.ne.s32.totalorder %s281_s20, %s921_s22  ;;  %p925_p12 = scmp.lt.s32.totalorder %s923_s9, %s921_s22 }
  0x73   : >> { %p926_p13 = por %p925_p12, %p924_p4 }
  0x75   : >> { %p927_p0 = pnand %p926_p13, %p922_p3 }
  0x77   : >> { %930 = shalt.err (!%p927_p0)  }
  0x78   : >> { %s931_s11 = scalar_lea.vmem %s294_s16, 16  ;;  %s1029_s12 = smov [#allocation2]  }
  0x79   : >> { %p932_p1 = scmp.ne.s32.totalorder %s294_s16, %s931_s11  ;;  %s933_s13 = sshll.u32 %s1029_s12, 4  ;;  %s934_s13 = int_to_ptr.vmem [resolvable:$false] %s933_s13 }
  0x7a   : >> { %s935_s14 = scalar_lea.vmem %s934_s13, 256  ;;  %p936_p2 = scmp.lt.s32.totalorder %s294_s16, %s934_s13 }
  0x7b   : >> { %p937_p5 = scmp.lt.s32.totalorder %s935_s14, %s931_s11 }
  0x7d   : >> { %p938_p8 = por %p937_p5, %p936_p2 }
  0x7f   : >> { %p939_p9 = pnand %p938_p8, %p932_p1 }
  0x81   : >> { %942 = shalt.err (!%p939_p9)  }
  0x82   : >> { %296 = dma.hbm_to_vmem [thread:$0]  %s281_s20, 16, %s294_s16, %s285_s21 }
  0x83   : >> { %s277_s28 = sadd.s32 1, %s1021_s28  }
  0x84   : >> { %p274_p11 = scmp.ge.s32.totalorder %s277_s28, 8  }
  0x86   : > { %276 = sbr.rel (!%p274_p11) target bundleno = 103 (0x67), region = 131 }
  0x8b PF: > { %v823_v0 = vld [vmem:[#allocation6 + $0x38] sm:$0xff]   ;;  %v1030_v1 = vmov 0.0   ;;  %v824_v2 = vld [vmem:[#allocation6 + $0x30] sm:$0xff]   ;;  %vm1031_vm0 = vmmov 0   ;;  %v825_v3 = vld [vmem:[#allocation6 + $0x28] sm:$0xff]  }
  0x8c   : > { %710 = vmatprep.subr.bf16.mxu0 %v1030_v1  ;;  %730 = vmatprep.subr.bf16.mxu1 %v1030_v1  ;;  %v831_v4 = vld [vmem:[#allocation9 + $0x38] sm:$0xff]   ;;  %v826_v5 = vld [vmem:[#allocation6 + $0x20] sm:$0xff]   ;;  %v832_v6 = vld [vmem:[#allocation9 + $0x30] sm:$0xff]  }
  0x8d   : > { %711 = vmatpush3.bf16.msra.mxu0 %v823_v0  ;;  %726 = vmatprep.mubr.msk.bf16.mxu0 %vm1031_vm0, %v1030_v1  ;;  %v827_v7 = vld [vmem:[#allocation6 + $0x18] sm:$0xff]   ;;  %v833_v8 = vld [vmem:[#allocation9 + $0x28] sm:$0xff]   ;;  %v828_v9 = vld [vmem:[#allocation6 + $0x10] sm:$0xff]  }
  0x8e   : > { %712 = vmatprep.subr.bf16.mxu0 %v1030_v1  ;;  %746 = vmatprep.mubr.msk.bf16.mxu1 %vm1031_vm0, %v1030_v1  ;;  %v834_v10 = vld [vmem:[#allocation9 + $0x20] sm:$0xff]   ;;  %v829_v11 = vld [vmem:[#allocation6 + $0x8] sm:$0xff]   ;;  %v835_v12 = vld [vmem:[#allocation9 + $0x18] sm:$0xff]  }
  0x8f   : > { %731 = vmatpush3.bf16.msra.mxu1 %v831_v4  ;;  %v830_v13 = vld [vmem:[#allocation6] sm:$0xff]   ;;  %v297_v14 = vld [vmem:[%s1166_s29] sm:$0xff]  ;;  %v837_v17 = vld [vmem:[#allocation9 + $0x8] sm:$0xff]  }
  0x90   : > { %732 = vmatprep.subr.bf16.mxu1 %v1030_v1  ;;  %v836_v15 = vld [vmem:[#allocation9 + $0x10] sm:$0xff]   ;;  %v298_v16 = vpack.c.bf16 %v297_v14, %v297_v14  ;;  %v838_v18 = vld [vmem:[#allocation9] sm:$0xff]  }
  0x91   : > { %713 = vmatpush3.bf16.msra.mxu0 %v824_v2  ;;  %v663_v19 = vld [vmem:[%s1238_s3] ss:$0 sm:$0xff] }
  0x92   : > { %714 = vmatprep.subr.bf16.mxu0 %v1030_v1  ;;  %v672_v27 = vld [vmem:[%s1240_s5] ss:$0 sm:$0xff] }
  0x93   : > { %733 = vmatpush3.bf16.msra.mxu1 %v832_v6 }
  0x94   : > { %734 = vmatprep.subr.bf16.mxu1 %v1030_v1 }
  0x95   : > { %715 = vmatpush3.bf16.msra.mxu0 %v825_v3 }
  0x96   : > { %716 = vmatprep.subr.bf16.mxu0 %v1030_v1 }
  0x97   : > { %735 = vmatpush3.bf16.msra.mxu1 %v833_v8 }
  0x98   : > { %736 = vmatprep.subr.bf16.mxu1 %v1030_v1 }
  0x99   : > { %717 = vmatpush3.bf16.msra.mxu0 %v826_v5 }
  0x9a   : > { %718 = vmatprep.subr.bf16.mxu0 %v1030_v1 }
  0x9b   : > { %737 = vmatpush3.bf16.msra.mxu1 %v834_v10 }
  0x9c   : > { %738 = vmatprep.subr.bf16.mxu1 %v1030_v1 }
  0x9d   : > { %719 = vmatpush3.bf16.msra.mxu0 %v827_v7 }
  0x9e   : > { %720 = vmatprep.subr.bf16.mxu0 %v1030_v1 }
  0x9f   : > { %739 = vmatpush3.bf16.msra.mxu1 %v835_v12 }
  0xa0   : > { %740 = vmatprep.subr.bf16.mxu1 %v1030_v1 }
  0xa1   : > { %721 = vmatpush3.bf16.msra.mxu0 %v828_v9 }
  0xa2   : > { %722 = vmatprep.subr.bf16.mxu0 %v1030_v1 }
  0xa3   : > { %741 = vmatpush3.bf16.msra.mxu1 %v836_v15 }
  0xa4   : > { %742 = vmatprep.subr.bf16.mxu1 %v1030_v1 }
  0xa5   : > { %723 = vmatpush3.bf16.msra.mxu0 %v829_v11 }
  0xa6   : > { %724 = vmatprep.subr.bf16.mxu0 %v1030_v1 }
  0xa7   : > { %743 = vmatpush3.bf16.msra.mxu1 %v837_v17 }
  0xa8   : > { %744 = vmatprep.subr.bf16.mxu1 %v1030_v1 }
  0xa9   : > { %725 = vmatpush3.bf16.msra.mxu0 %v830_v13 }
  0xab   : > { %745 = vmatpush3.bf16.msra.mxu1 %v838_v18 }
  0xac   : > { %727 = vmatmul.mubr.bf16.vlgmr.msra.gmra.mxu0 %v298_v16 }
 0x16c   : > { %v404_v20 = vpop.f32.mrf.mxu0 }
 0x16d   : > { %v405_v21 = vadd.f32 %v663_v19, %v404_v20 }
 0x16e   : > { %v728_v22 = vpop.f32.mrf.mxu0 }
 0x16f   : > { %v410_v23 = vmax.f32 %v405_v21, 0.0 }
 0x170   : > { %v407_v24 = vpop.f32.mrf.mxu0 }
 0x171   : > { %v411_v25 = vpack.c.bf16 %v410_v23, %v410_v23 }
 0x172   : > { %v729_v26 = vpop.f32.mrf.mxu0 }
 0x173   : > { %747 = vmatmul.mubr.bf16.vlgmr.msra.gmra.mxu1 %v411_v25 }
 0x233   : > { %v517_v28 = vpop.f32.mrf.mxu1 }
 0x234   : > { %v518_v29 = vadd.f32 %v672_v27, %v517_v28 }
 0x235   : > { %v748_v30 = vpop.f32.mrf.mxu1  ;;  %526 = sbr.rel (%p656_p6) target bundleno = 571 (0x23b), region = 78 }
 0x236   : > { %v523_v31 = vmax.f32 %v518_v29, 0.0 }
 0x237   : > { %v520_v32 = vpop.f32.mrf.mxu1 }
 0x239   : > { %v749_v33 = vpop.f32.mrf.mxu1 }
 0x23a   : > { %527 = vst [vmem:[#allocation11] sm:$0xff] %v523_v31 }
 0x23b PF: > { %p682_p10 = scmp.le.s32.totalorder %s1005_s24, 0 }
 0x23d   : > { %531 = sbr.rel (%p682_p10) target bundleno = 582 (0x246), region = 82 }
 0x242   : > { %v532_v34 = vld [vmem:[#allocation11] sm:$0xff] }
 0x243   : > { %v533_v35 = vadd.f32 %v532_v34, %v523_v31 }
 0x245   : > { %534 = vst [vmem:[#allocation11] sm:$0xff] %v533_v35 }
 0x246 PF: > { %p683_p7 = scmp.ne.s32.totalorder %s1005_s24, 1 }
 0x248   : > { %538 = sbr.rel (%p683_p7) target bundleno = 593 (0x251), region = 86 }
 0x24d   : > { %v539_v36 = vld [vmem:[#allocation11] sm:$0xff] }
 0x24e   : > { %v540_v37 = vmul.f32 0.5, %v539_v36 }
 0x250   : > { %541 = vst [vmem:[#allocation11] sm:$0xff] %v540_v37 }
 0x251 PF: > { %s1248_s7 = sadd.s32 4294967295, %s1013_s26   ;;  %s1032_s28 = smov [#allocation11]  }
 0x252   : > { %p1211_p3 = scmp.eq.s32.totalorder %s1248_s7, 1  ;;  %s551_s15 = sshll.u32 %s1032_s28, 4  ;;  %s552_s15 = int_to_ptr.vmem [resolvable:$true] %s551_s15 }
 0x253   : > { %s943_s16 = scalar_lea.vmem %s552_s15, 128  ;;  %p950_p13 = scmp.lt.s32.totalorder %s552_s15, %s552_s15 }
 0x254   : > { %p944_p6 = scmp.ne.s32.totalorder %s552_s15, %s943_s16  ;;  %p951_p0 = scmp.lt.s32.totalorder %s943_s16, %s943_s16 }
 0x256   : > { %p945_p4 = pnand %p944_p6, %p1211_p3  ;;  %p952_p1 = por %p951_p0, %p950_p13 }
 0x258   : > { %p946_p12 = pneg %p945_p4 }
 0x25a   : > { %p953_p2 = pnand %p952_p1, %p946_p12 }
 0x25c   : > { %956 = shalt.err (!%p953_p2)
}
 0x25d   : > { %759 = dma.vmem_to_hbm [thread:$0]  (%p1211_p3), %s552_s15, 128, %s1241_s6, [#allocation8]  }
 0x25e   : > { %1000 = dma.done.wait (%p1211_p3), [#allocation8], 128  }
 0x25f   : > { %1002 = vsyncadd (%p1211_p3), [#allocation8], 4294967168 }
 0x260 PF: > { %s23_s26 = sadd.s32 1, %s1013_s26   ;;  %s1250_s24 = smov %s1009_s25 }
 0x261   : > { %p20_p5 = scmp.ge.s32.totalorder %s23_s26, 4   ;;  %s1251_s25 = smov %s1253_s27 }
 0x263   :  { %22 = sbr.rel (!%p20_p5) target bundleno = 10 (0xa), region = 142 }
 0x268   :  { %564 = vsyncpa [#allocation7], 1 }
 0x269   :  { %566 = vsyncpa [#allocation7 + $0x1], 1 }
 0x26a   :  { %567 = vsyncpa [#allocation10], 1 }
 0x26b   :  { %568 = vsyncpa [#allocation8], 1 }
 0x26c   :  { %570 = vsyncpa [#allocation8 + $0x1], 1 }
 0x26d   :  { %571 = vsyncmov [#allocation3] }
 0x270   :  { %s572_s18 = vpop.sfrf %571 }
 0x271   :  { %p688_p8 = scmp.ne.s32.totalorder %s572_s18, 0 }
 0x273   :  { %576 = shalt.err (%p688_p8)  }
 0x274   :  { %578 = vsyncmov [#allocation3 + $0x1] }
 0x277   :  { %s579_s19 = vpop.sfrf %578 }
 0x278   :  { %p689_p9 = scmp.ne.s32.totalorder %s579_s19, 0 }
 0x27a   :  { %583 = shalt.err (%p689_p9)  }

</bundles_post_ra>
